<compile_context>
chip_gen: v6e
topology: v6e:2x2x1
jax: 0.10.0
libtpu: 0.0.40
codegen_flags: <defaults>
</compile_context>

<pallas_src>
import functools

import jax
import jax.numpy as jnp
from jax.experimental import pallas as pl
from jax.experimental.pallas import tpu as pltpu


def _round_up(x, m):
    return ((x + m - 1) // m) * m


# ----------------------------------------------------------------------------
# Pallas kernel: one batch tile per grid step, weights VMEM-resident.
# ----------------------------------------------------------------------------
def rainbow_kernel(obs_ref,
                   w1_ref, b1_ref,
                   w2_ref, b2_ref,
                   wh_ref, bh_ref,     # fused [value_noisy1 | adv_noisy1]
                   wo_ref, bo_ref,     # fused block-diag [value_noisy2 ; adv_noisy2]
                   out_ref,
                   *, action_dim, atoms_num):
    A, K = action_dim, atoms_num

    x = obs_ref[...].astype(jnp.bfloat16)                               # (T, obs)

    # feature = relu(fc2(relu(fc1(obs))))
    h1 = jnp.dot(x, w1_ref[...], preferred_element_type=jnp.float32) + b1_ref[...]
    h1 = jnp.maximum(h1, 0.0).astype(jnp.bfloat16)                      # (T, 128)
    h2 = jnp.dot(h1, w2_ref[...], preferred_element_type=jnp.float32) + b2_ref[...]
    h2 = jnp.maximum(h2, 0.0).astype(jnp.bfloat16)                      # (T, 256)

    # fused first-level heads: [relu(value_noisy1(h2)) | relu(adv_noisy1(h2))]
    heads = jnp.dot(h2, wh_ref[...], preferred_element_type=jnp.float32) + bh_ref[...]
    heads = jnp.maximum(heads, 0.0).astype(jnp.bfloat16)                # (T, 512)

    # fused block-diagonal second level: cols [0:K) = value, [K:K+A*K) = adv,
    # remaining lanes are zero padding (sliced off before any reduction).
    out2 = jnp.dot(heads, wo_ref[...], preferred_element_type=jnp.float32) + bo_ref[...]

    bsz = out2.shape[0]
    value = out2[:, :K]                                                 # (T, K)
    adv = out2[:, K:K + A * K].reshape(bsz, A, K)                       # (T, A, K)

    # dist = value[:,None,:] + adv - adv.mean(axis=1, keepdims=True)
    dist = value[:, None, :] + adv - jnp.mean(adv, axis=1, keepdims=True)

    # numerically stable softmax over the atoms axis (f32)
    dist = dist - jnp.max(dist, axis=2, keepdims=True)
    e = jnp.exp(dist)
    p = e / jnp.sum(e, axis=2, keepdims=True)

    # lane-contiguous 2-D store; wrapper reshapes to (B, A, K)
    out_ref[...] = p.reshape(bsz, A * K)


# ----------------------------------------------------------------------------
# Wrapper: batch grid + constant-index weight specs.
# ----------------------------------------------------------------------------
def rainbow_forward(obs, params, *, action_dim, atoms_num, tile_b=512):
    batch, obs_dim = obs.shape
    w1, b1, w2, b2, wh, bh, wo, bo = params
    out_cols = action_dim * atoms_num

    # Batch tile: multiple of 8 (f32 sublane), capped to keep the working set
    # small enough for v5e/v7x scoped-VMEM defaults while amortizing step cost.
    tb = min(tile_b, _round_up(batch, 8))
    b_pad = _round_up(batch, tb)
    obs_p = obs if b_pad == batch else jnp.pad(obs, ((0, b_pad - batch), (0, 0)))
    grid = (b_pad // tb,)

    n_pad_out = wo.shape[1]
    flops = 2 * b_pad * (obs_dim * 128 + 128 * 256 + 256 * 512 + 512 * n_pad_out)
    param_bytes = sum(int(a.size) * a.dtype.itemsize for a in params)
    bytes_accessed = (int(obs_p.size) * obs_p.dtype.itemsize
                      + param_bytes + b_pad * out_cols * 4)

    kernel = functools.partial(rainbow_kernel,
                               action_dim=action_dim, atoms_num=atoms_num)

    rep = lambda i: (0, 0)   # weights/biases: fetched once, VMEM-resident
    in_specs = [
        pl.BlockSpec((tb, obs_dim), lambda i: (i, 0)),
        pl.BlockSpec(w1.shape, rep), pl.BlockSpec(b1.shape, rep),
        pl.BlockSpec(w2.shape, rep), pl.BlockSpec(b2.shape, rep),
        pl.BlockSpec(wh.shape, rep), pl.BlockSpec(bh.shape, rep),
        pl.BlockSpec(wo.shape, rep), pl.BlockSpec(bo.shape, rep),
    ]
    out_spec = pl.BlockSpec((tb, out_cols), lambda i: (i, 0))

    out2d = pl.pallas_call(
        kernel,
        out_shape=jax.ShapeDtypeStruct((b_pad, out_cols), jnp.float32),
        grid_spec=pltpu.PrefetchScalarGridSpec(
            num_scalar_prefetch=0,
            grid=grid,
            in_specs=in_specs,
            out_specs=out_spec),
        compiler_params=pltpu.CompilerParams(
            dimension_semantics=("parallel",)),
        cost_estimate=pl.CostEstimate(
            flops=flops,
            transcendentals=b_pad * out_cols,
            bytes_accessed=bytes_accessed),
    )(obs_p, *params)

    return out2d[:batch].reshape(batch, action_dim, atoms_num)


# ----------------------------------------------------------------------------
# Deterministic parameter construction (mirrors the PyTorch __init__ shapes)
# ----------------------------------------------------------------------------
def _linear_params(key, in_dim, out_dim):
    kw, kb = jax.random.split(key)
    bound = 1.0 / jnp.sqrt(jnp.float32(in_dim))
    w = jax.random.uniform(kw, (out_dim, in_dim), jnp.float32, -bound, bound)
    b = jax.random.uniform(kb, (out_dim,), jnp.float32, -bound, bound)
    return w.T, b.reshape(1, out_dim)          # (in, out), (1, out)


def _scale_noise(key, size):
    n = jax.random.normal(key, (size,), jnp.float32)
    return jnp.sign(n) * jnp.sqrt(jnp.abs(n))


def _noisy_linear_params(key, in_dim, out_dim, std_init=0.4):
    """Effective (training-mode) weight/bias of NoisyLinear."""
    # TODO(synk): noise is sampled once here; PyTorch reset_noise() would
    # resample epsilon per call — rebuild params to refresh noise.
    kmu_w, kmu_b, kin, kout, kb = jax.random.split(key, 5)
    mu_range = 1.0 / jnp.sqrt(jnp.float32(in_dim))
    weight_mu = jax.random.uniform(kmu_w, (out_dim, in_dim), jnp.float32,
                                   -mu_range, mu_range)
    bias_mu = jax.random.uniform(kmu_b, (out_dim,), jnp.float32,
                                 -mu_range, mu_range)
    weight_sigma = jnp.full((out_dim, in_dim),
                            std_init / jnp.sqrt(jnp.float32(in_dim)), jnp.float32)
    bias_sigma = jnp.full((out_dim,),
                          std_init / jnp.sqrt(jnp.float32(out_dim)), jnp.float32)
    eps_in = _scale_noise(kin, in_dim)
    eps_out = _scale_noise(kout, out_dim)
    w = weight_mu + weight_sigma * jnp.outer(eps_out, eps_in)
    b = bias_mu + bias_sigma * _scale_noise(kb, out_dim)
    return w.T, b.reshape(1, out_dim)          # (in, out), (1, out)


def build_params(key, observation_dim, action_dim, atoms_num):
    keys = jax.random.split(key, 6)
    w1, b1 = _linear_params(keys[0], observation_dim, 128)
    w2, b2 = _linear_params(keys[1], 128, 256)
    wv1, bv1 = _noisy_linear_params(keys[2], 256, 256)
    wv2, bv2 = _noisy_linear_params(keys[3], 256, atoms_num)
    wa1, ba1 = _noisy_linear_params(keys[4], 256, 256)
    wa2, ba2 = _noisy_linear_params(keys[5], 256, action_dim * atoms_num)

    # Fused first-level head: [wv1 | wa1] -> (256, 512)
    wh = jnp.concatenate([wv1, wa1], axis=1)
    bh = jnp.concatenate([bv1, ba1], axis=1)

    # Fused block-diagonal second-level head: (512, Npad), lane-padded to 128
    K, AK = atoms_num, action_dim * atoms_num
    n_pad = _round_up(K + AK, 128)
    wo = jnp.zeros((512, n_pad), jnp.float32)
    wo = wo.at[:256, :K].set(wv2)
    wo = wo.at[256:, K:K + AK].set(wa2)
    bo = jnp.zeros((1, n_pad), jnp.float32)
    bo = bo.at[:, :K].set(bv2[0])
    bo = bo.at[:, K:K + AK].set(ba2[0])

    # bf16 weights (MXU inputs); biases stay f32 (added to f32 accumulators).
    bf = lambda a: a.astype(jnp.bfloat16)
    return (bf(w1), b1, bf(w2), b2, bf(wh), bh, bf(wo), bo)


# ----------------------------------------------------------------------------
# Pure-JAX reference mirroring the kernel's bf16/f32 numerics
# ----------------------------------------------------------------------------
def rainbow_reference(obs, params, *, action_dim, atoms_num):
    w1, b1, w2, b2, wh, bh, wo, bo = params

    def mm(x, w, b):
        return jnp.dot(x.astype(jnp.bfloat16), w,
                       preferred_element_type=jnp.float32) + b

    h1 = jax.nn.relu(mm(obs, w1, b1))
    h2 = jax.nn.relu(mm(h1, w2, b2))
    heads = jax.nn.relu(mm(h2, wh, bh))
    out2 = mm(heads, wo, bo)

    A, K = action_dim, atoms_num
    value = out2[:, :K]
    adv = out2[:, K:K + A * K].reshape(obs.shape[0], A, K)
    dist = value[:, None, :] + adv - adv.mean(axis=1, keepdims=True)
    return jax.nn.softmax(dist, axis=2)


# ----------------------------------------------------------------------------
if __name__ == "__main__":
    observation_dim = 16
    action_dim = 4
    atoms_num = 8
    batch = 2

    key = jax.random.PRNGKey(0)
    k_obs, k_params = jax.random.split(key)

    obs = jax.random.normal(k_obs, (batch, observation_dim), jnp.float32)
    params = build_params(k_params, observation_dim, action_dim, atoms_num)

    dist = rainbow_forward(obs, params, action_dim=action_dim, atoms_num=atoms_num)
    dist = jax.block_until_ready(dist)

    ref = rainbow_reference(obs, params, action_dim=action_dim, atoms_num=atoms_num)
    assert dist.shape == (batch, action_dim, atoms_num)
    assert jnp.allclose(dist, ref, atol=1e-3, rtol=1e-3), "mismatch vs JAX reference"
    assert jnp.allclose(dist.sum(axis=2), 1.0, atol=1e-5), "softmax not normalized"

    print("KERNEL_OK")
</pallas_src>

<mosaic_0001>
module attributes {stable_mosaic.version = 11 : i64} {
  func.func @rainbow_kernel(%arg0: i32, %arg1: memref<8x16xf32, #tpu.memory_space<vmem>>, %arg2: memref<16x128xbf16, #tpu.memory_space<vmem>>, %arg3: memref<1x128xf32, #tpu.memory_space<vmem>>, %arg4: memref<128x256xbf16, #tpu.memory_space<vmem>>, %arg5: memref<1x256xf32, #tpu.memory_space<vmem>>, %arg6: memref<256x512xbf16, #tpu.memory_space<vmem>>, %arg7: memref<1x512xf32, #tpu.memory_space<vmem>>, %arg8: memref<512x128xbf16, #tpu.memory_space<vmem>>, %arg9: memref<1x128xf32, #tpu.memory_space<vmem>>, %arg10: memref<8x32xf32, #tpu.memory_space<vmem>>) attributes {dimension_semantics = [#tpu.dimension_semantics<parallel>], iteration_bounds = array<i64: 1>, scalar_prefetch = 0 : i64, scratch_operands = 0 : i64, tpu.core_type = #tpu.core_type<tc>, window_params = [{transform_indices = @transform_0, window_bounds = array<i64: 8, 16>}, {pipeline_mode = #tpu.pipeline_mode<synchronous>, transform_indices = @transform_1, window_bounds = array<i64: 16, 128>}, {pipeline_mode = #tpu.pipeline_mode<synchronous>, transform_indices = @transform_2, window_bounds = array<i64: 1, 128>}, {pipeline_mode = #tpu.pipeline_mode<synchronous>, transform_indices = @transform_3, window_bounds = array<i64: 128, 256>}, {pipeline_mode = #tpu.pipeline_mode<synchronous>, transform_indices = @transform_4, window_bounds = array<i64: 1, 256>}, {pipeline_mode = #tpu.pipeline_mode<synchronous>, transform_indices = @transform_5, window_bounds = array<i64: 256, 512>}, {pipeline_mode = #tpu.pipeline_mode<synchronous>, transform_indices = @transform_6, window_bounds = array<i64: 1, 512>}, {pipeline_mode = #tpu.pipeline_mode<synchronous>, transform_indices = @transform_7, window_bounds = array<i64: 512, 128>}, {pipeline_mode = #tpu.pipeline_mode<synchronous>, transform_indices = @transform_8, window_bounds = array<i64: 1, 128>}, {transform_indices = @transform_9, window_bounds = array<i64: 8, 32>}]} {
    %c0 = arith.constant 0 : index
    %c0_0 = arith.constant 0 : index
    %0 = vector.load %arg1[%c0, %c0_0] : memref<8x16xf32, #tpu.memory_space<vmem>>, vector<8x16xf32>
    %1 = arith.truncf %0 : vector<8x16xf32> to vector<8x16xbf16>
    %c0_1 = arith.constant 0 : index
    %c0_2 = arith.constant 0 : index
    %2 = vector.load %arg2[%c0_1, %c0_2] : memref<16x128xbf16, #tpu.memory_space<vmem>>, vector<16x128xbf16>
    %cst = arith.constant dense<0.000000e+00> : vector<8x128xf32>
    %3 = tpu.matmul %1, %2, %cst {dimension_numbers = #tpu.dot_dimension_numbers<[1], [0], [0], [1], [0, 0, 1, 1], [], []>} : vector<8x16xbf16>, vector<16x128xbf16>, vector<8x128xf32> -> vector<8x128xf32>
    %c0_3 = arith.constant 0 : index
    %c0_4 = arith.constant 0 : index
    %4 = vector.load %arg3[%c0_3, %c0_4] : memref<1x128xf32, #tpu.memory_space<vmem>>, vector<1x128xf32>
    %5 = vector.broadcast %4 : vector<1x128xf32> to vector<8x128xf32>
    %6 = arith.addf %3, %5 : vector<8x128xf32>
    %cst_5 = arith.constant 0.000000e+00 : f32
    %7 = vector.broadcast %cst_5 : f32 to vector<8x128xf32>
    %8 = arith.maximumf %6, %7 : vector<8x128xf32>
    %9 = arith.truncf %8 : vector<8x128xf32> to vector<8x128xbf16>
    %c0_6 = arith.constant 0 : index
    %c0_7 = arith.constant 0 : index
    %10 = vector.load %arg4[%c0_6, %c0_7] : memref<128x256xbf16, #tpu.memory_space<vmem>>, vector<128x256xbf16>
    %cst_8 = arith.constant dense<0.000000e+00> : vector<8x256xf32>
    %11 = tpu.matmul %9, %10, %cst_8 {dimension_numbers = #tpu.dot_dimension_numbers<[1], [0], [0], [1], [0, 0, 1, 1], [], []>} : vector<8x128xbf16>, vector<128x256xbf16>, vector<8x256xf32> -> vector<8x256xf32>
    %c0_9 = arith.constant 0 : index
    %c0_10 = arith.constant 0 : index
    %12 = vector.load %arg5[%c0_9, %c0_10] : memref<1x256xf32, #tpu.memory_space<vmem>>, vector<1x256xf32>
    %13 = vector.broadcast %12 : vector<1x256xf32> to vector<8x256xf32>
    %14 = arith.addf %11, %13 : vector<8x256xf32>
    %cst_11 = arith.constant 0.000000e+00 : f32
    %15 = vector.broadcast %cst_11 : f32 to vector<8x256xf32>
    %16 = arith.maximumf %14, %15 : vector<8x256xf32>
    %17 = arith.truncf %16 : vector<8x256xf32> to vector<8x256xbf16>
    %c0_12 = arith.constant 0 : index
    %c0_13 = arith.constant 0 : index
    %18 = vector.load %arg6[%c0_12, %c0_13] : memref<256x512xbf16, #tpu.memory_space<vmem>>, vector<256x512xbf16>
    %cst_14 = arith.constant dense<0.000000e+00> : vector<8x512xf32>
    %19 = tpu.matmul %17, %18, %cst_14 {dimension_numbers = #tpu.dot_dimension_numbers<[1], [0], [0], [1], [0, 0, 1, 1], [], []>} : vector<8x256xbf16>, vector<256x512xbf16>, vector<8x512xf32> -> vector<8x512xf32>
    %c0_15 = arith.constant 0 : index
    %c0_16 = arith.constant 0 : index
    %20 = vector.load %arg7[%c0_15, %c0_16] : memref<1x512xf32, #tpu.memory_space<vmem>>, vector<1x512xf32>
    %21 = vector.broadcast %20 : vector<1x512xf32> to vector<8x512xf32>
    %22 = arith.addf %19, %21 : vector<8x512xf32>
    %cst_17 = arith.constant 0.000000e+00 : f32
    %23 = vector.broadcast %cst_17 : f32 to vector<8x512xf32>
    %24 = arith.maximumf %22, %23 : vector<8x512xf32>
    %25 = arith.truncf %24 : vector<8x512xf32> to vector<8x512xbf16>
    %c0_18 = arith.constant 0 : index
    %c0_19 = arith.constant 0 : index
    %26 = vector.load %arg8[%c0_18, %c0_19] : memref<512x128xbf16, #tpu.memory_space<vmem>>, vector<512x128xbf16>
    %cst_20 = arith.constant dense<0.000000e+00> : vector<8x128xf32>
    %27 = tpu.matmul %25, %26, %cst_20 {dimension_numbers = #tpu.dot_dimension_numbers<[1], [0], [0], [1], [0, 0, 1, 1], [], []>} : vector<8x512xbf16>, vector<512x128xbf16>, vector<8x128xf32> -> vector<8x128xf32>
    %c0_21 = arith.constant 0 : index
    %c0_22 = arith.constant 0 : index
    %28 = vector.load %arg9[%c0_21, %c0_22] : memref<1x128xf32, #tpu.memory_space<vmem>>, vector<1x128xf32>
    %29 = vector.broadcast %28 : vector<1x128xf32> to vector<8x128xf32>
    %30 = arith.addf %27, %29 : vector<8x128xf32>
    %31 = vector.extract_strided_slice %30 {offsets = [0, 0], sizes = [8, 8], strides = [1, 1]} : vector<8x128xf32> to vector<8x8xf32>
    %32 = vector.extract_strided_slice %30 {offsets = [0, 8], sizes = [8, 32], strides = [1, 1]} : vector<8x128xf32> to vector<8x32xf32>
    %33 = vector.shape_cast %32 : vector<8x32xf32> to vector<8x4x8xf32>
    %34 = vector.shape_cast %31 : vector<8x8xf32> to vector<8x1x8xf32>
    %35 = vector.broadcast %34 : vector<8x1x8xf32> to vector<8x4x8xf32>
    %36 = arith.addf %35, %33 : vector<8x4x8xf32>
    %cst_23 = arith.constant dense<0.000000e+00> : vector<8x8xf32>
    %37 = vector.multi_reduction <add>, %33, %cst_23 [1] : vector<8x4x8xf32> to vector<8x8xf32>
    %38 = vector.shape_cast %37 : vector<8x8xf32> to vector<8x1x8xf32>
    %cst_24 = arith.constant 4.000000e+00 : f32
    %39 = vector.broadcast %cst_24 : f32 to vector<8x1x8xf32>
    %40 = arith.divf %38, %39 : vector<8x1x8xf32>
    %41 = vector.broadcast %40 : vector<8x1x8xf32> to vector<8x4x8xf32>
    %42 = arith.subf %36, %41 : vector<8x4x8xf32>
    %cst_25 = arith.constant dense<0xFF800000> : vector<8x4xf32>
    %43 = vector.multi_reduction <maximumf>, %42, %cst_25 [2] : vector<8x4x8xf32> to vector<8x4xf32>
    %44 = vector.shape_cast %43 : vector<8x4xf32> to vector<8x4x1xf32>
    %45 = vector.broadcast %44 : vector<8x4x1xf32> to vector<8x4x8xf32>
    %46 = arith.subf %42, %45 : vector<8x4x8xf32>
    %47 = math.exp %46 : vector<8x4x8xf32>
    %cst_26 = arith.constant dense<0.000000e+00> : vector<8x4xf32>
    %48 = vector.multi_reduction <add>, %47, %cst_26 [2] : vector<8x4x8xf32> to vector<8x4xf32>
    %49 = vector.shape_cast %48 : vector<8x4xf32> to vector<8x4x1xf32>
    %50 = vector.broadcast %49 : vector<8x4x1xf32> to vector<8x4x8xf32>
    %51 = arith.divf %47, %50 : vector<8x4x8xf32>
    %52 = vector.shape_cast %51 : vector<8x4x8xf32> to vector<8x32xf32>
    %c0_27 = arith.constant 0 : index
    %c0_28 = arith.constant 0 : index
    %53 = vector.load %arg10[%c0_27, %c0_28] : memref<8x32xf32, #tpu.memory_space<vmem>>, vector<8x32xf32>
    tpu.vector_store %arg10[%c0_27, %c0_28], %52 {strides = array<i32>} : memref<8x32xf32, #tpu.memory_space<vmem>>, vector<8x32xf32>,
    return
  }
  func.func @transform_0(%arg0: i32) -> (i32, i32) {
    %c0_i32 = arith.constant 0 : i32
    %c0_i32_0 = arith.constant 0 : i32
    return %arg0, %c0_i32 : i32, i32
  }
  func.func @transform_1(%arg0: i32) -> (i32, i32) {
    %c0_i32 = arith.constant 0 : i32
    %c0_i32_0 = arith.constant 0 : i32
    %c0_i32_1 = arith.constant 0 : i32
    return %c0_i32, %c0_i32_0 : i32, i32
  }
  func.func @transform_2(%arg0: i32) -> (i32, i32) {
    %c0_i32 = arith.constant 0 : i32
    %c0_i32_0 = arith.constant 0 : i32
    %c0_i32_1 = arith.constant 0 : i32
    return %c0_i32, %c0_i32_0 : i32, i32
  }
  func.func @transform_3(%arg0: i32) -> (i32, i32) {
    %c0_i32 = arith.constant 0 : i32
    %c0_i32_0 = arith.constant 0 : i32
    %c0_i32_1 = arith.constant 0 : i32
    return %c0_i32, %c0_i32_0 : i32, i32
  }
  func.func @transform_4(%arg0: i32) -> (i32, i32) {
    %c0_i32 = arith.constant 0 : i32
    %c0_i32_0 = arith.constant 0 : i32
    %c0_i32_1 = arith.constant 0 : i32
    return %c0_i32, %c0_i32_0 : i32, i32
  }
  func.func @transform_5(%arg0: i32) -> (i32, i32) {
    %c0_i32 = arith.constant 0 : i32
    %c0_i32_0 = arith.constant 0 : i32
    %c0_i32_1 = arith.constant 0 : i32
    return %c0_i32, %c0_i32_0 : i32, i32
  }
  func.func @transform_6(%arg0: i32) -> (i32, i32) {
    %c0_i32 = arith.constant 0 : i32
    %c0_i32_0 = arith.constant 0 : i32
    %c0_i32_1 = arith.constant 0 : i32
    return %c0_i32, %c0_i32_0 : i32, i32
  }
  func.func @transform_7(%arg0: i32) -> (i32, i32) {
    %c0_i32 = arith.constant 0 : i32
    %c0_i32_0 = arith.constant 0 : i32
    %c0_i32_1 = arith.constant 0 : i32
    return %c0_i32, %c0_i32_0 : i32, i32
  }
  func.func @transform_8(%arg0: i32) -> (i32, i32) {
    %c0_i32 = arith.constant 0 : i32
    %c0_i32_0 = arith.constant 0 : i32
    %c0_i32_1 = arith.constant 0 : i32
    return %c0_i32, %c0_i32_0 : i32, i32
  }
  func.func @transform_9(%arg0: i32) -> (i32, i32) {
    %c0_i32 = arith.constant 0 : i32
    %c0_i32_0 = arith.constant 0 : i32
    return %arg0, %c0_i32 : i32, i32
  }
}

</mosaic_0001>

<bundles_post_ra>
// kernel: tpu_custom_call.1
= control target key start
LH: loop header
LB: loop body
LE: loop exit
PB: predicated region body
PF: predicated region fallthrough
CT: control target
= control target key end

     0   :  { %14 = vsyncpa [#allocation3], 0  ;;  %s2324_s0 = inlined_call_operand.hbm [shape: f32[8,16], index: 0, kind: input, shape index: {}]   ;;  %s2325_s1 = inlined_call_operand.hbm [shape: bf16[16,128], index: 1, kind: input, shape index: {}]   ;;  %s2326_s2 = inlined_call_operand.vmem [shape: f32[1,128], index: 2, kind: input, shape index: {}]   ;;  %s2327_s3 = inlined_call_operand.hbm [shape: bf16[128,256], index: 3, kind: input, shape index: {}]   ;;  %s2328_s4 = inlined_call_operand.vmem [shape: f32[1,256], index: 4, kind: input, shape index: {}]   ;;  %s2329_s5 = inlined_call_operand.hbm [shape: bf16[256,512], index: 5, kind: input, shape index: {}]   ;;  %s2330_s6 = inlined_call_operand.vmem [shape: f32[1,512], index: 6, kind: input, shape index: {}]   ;;  %s2331_s7 = inlined_call_operand.hbm [shape: bf16[512,128], index: 7, kind: input, shape index: {}]   ;;  %s2332_s8 = inlined_call_operand.vmem [shape: f32[1,128], index: 8, kind: input, shape index: {}]   ;;  %s2333_s9 = inlined_call_operand.hbm [shape: f32[8,32], index: 9, kind: output, shape index: {}]  }
   0x1   :  { %15 = vsyncpa [#allocation6], 0 }
   0x2   :  { %16 = vsyncpa [#allocation9], 0 }
   0x3   :  { %17 = vsyncpa [#allocation4], 0  ;;  %s2106_s30 = smov [#allocation5]  }
   0x4   :  { %s33_s10 = sshll.u32 %s2106_s30, 4  ;;  %s34_s10 = int_to_ptr.vmem [resolvable:$true] %s33_s10 }
   0x5   :  { %s1986_s11 = scalar_lea.vmem %s34_s10, 128  ;;  %p1991_p1 = scmp.lt.s32.totalorder %s34_s10, %s34_s10 }
   0x6   :  { %p1987_p0 = scmp.ne.s32.totalorder %s34_s10, %s1986_s11  ;;  %p1992_p2 = scmp.lt.s32.totalorder %s1986_s11, %s1986_s11 }
   0x8   :  { %p1993_p3 = por %p1992_p2, %p1991_p1 }
   0xa   :  { %p1994_p4 = pnand %p1993_p3, %p1987_p0 }
   0xc   :  { %1997 = shalt.err (!%p1994_p4)
}
   0xd   :  { %s2107_s12 = smov 64   ;;  %s2108_s13 = smov 4  }
   0xe   :  { %39 = dma.hbm_to_vmem [thread:$0]  %s2325_s1, 128, %s34_s10, [#allocation6], %s2107_s12, %s2107_s12, %s2108_s13  }
   0xf   :  { %s2109_s16 = smov [#allocation8]  }
  0x10   :  { %s61_s17 = sshll.u32 %s2109_s16, 4  ;;  %s62_s17 = int_to_ptr.vmem [resolvable:$true] %s61_s17 }
  0x11   :  { %s2006_s18 = scalar_lea.vmem %s62_s17, 8192  ;;  %p2011_p6 = scmp.lt.s32.totalorder %s62_s17, %s62_s17 }
  0x12   :  { %p2007_p5 = scmp.ne.s32.totalorder %s62_s17, %s2006_s18  ;;  %p2012_p7 = scmp.lt.s32.totalorder %s2006_s18, %s2006_s18 }
  0x14   :  { %p2013_p8 = por %p2012_p7, %p2011_p6 }
  0x16   :  { %p2014_p9 = pnand %p2013_p8, %p2007_p5 }
  0x18   :  { %2017 = shalt.err (!%p2014_p9)
}
  0x19   :  { %s2110_s19 = smov 256   ;;  %s2111_s20 = smov 16  }
  0x1a   :  { %67 = dma.hbm_to_vmem [thread:$0]  %s2329_s5, 8192, %s62_s17, [#allocation9], %s2110_s19, %s2110_s19, %s2111_s20  }
  0x1b   :  { %s2112_s23 = smov [#allocation2]   ;;  %s2113_s1 = smov [#allocation7]  }
  0x1c   :  { %s24_s24 = sshll.u32 %s2112_s23, 4  ;;  %s47_s25 = sshll.u32 %s2113_s1, 4  ;;  %s25_s24 = int_to_ptr.vmem [resolvable:$true] %s24_s24  ;;  %s48_s25 = int_to_ptr.vmem [resolvable:$true] %s47_s25 }
  0x1d   :  { %s2026_s26 = scalar_lea.vmem %s25_s24, 128  ;;  %p2031_p11 = scmp.lt.s32.totalorder %s25_s24, %s25_s24 }
  0x1e   :  { %p2027_p10 = scmp.ne.s32.totalorder %s25_s24, %s2026_s26  ;;  %p2032_p12 = scmp.lt.s32.totalorder %s2026_s26, %s2026_s26 }
  0x20   :  { %p2033_p13 = por %p2032_p12, %p2031_p11 }
  0x22   :  { %p2034_p0 = pnand %p2033_p13, %p2027_p10 }
  0x24   :  { %2037 = shalt.err (!%p2034_p0)
}
  0x25   :  { %27 = dma.hbm_to_vmem [thread:$0]  %s2324_s0, 128, %s25_s24, [#allocation3]  }
  0x26   :  { %s2046_s29 = scalar_lea.vmem %s48_s25, 2048  ;;  %p2051_p2 = scmp.lt.s32.totalorder %s48_s25, %s48_s25 }
  0x27   :  { %p2047_p1 = scmp.ne.s32.totalorder %s48_s25, %s2046_s29  ;;  %p2052_p3 = scmp.lt.s32.totalorder %s2046_s29, %s2046_s29 }
  0x29   :  { %p2053_p4 = por %p2052_p3, %p2051_p2 }
  0x2b   :  { %p2054_p5 = pnand %p2053_p4, %p2047_p1 }
  0x2d   :  { %2057 = shalt.err (!%p2054_p5)
}
  0x2e   :  { %s2114_s5 = smov 128   ;;  %s2115_s30 = smov 8  }
  0x2f   :  { %53 = dma.hbm_to_vmem [thread:$0]  %s2327_s3, 2048, %s48_s25, [#allocation6], %s2114_s5, %s2114_s5, %s2115_s30  }
  0x30   :  { %s2116_s14 = smov [#allocation10]  }
  0x31   :  { %s75_s15 = sshll.u32 %s2116_s14, 4  ;;  %s76_s15 = int_to_ptr.vmem [resolvable:$true] %s75_s15 }
  0x32   :  { %s2066_s16 = scalar_lea.vmem %s76_s15, 4096  ;;  %p2071_p7 = scmp.lt.s32.totalorder %s76_s15, %s76_s15 }
  0x33   :  { %p2067_p6 = scmp.ne.s32.totalorder %s76_s15, %s2066_s16  ;;  %p2072_p8 = scmp.lt.s32.totalorder %s2066_s16, %s2066_s16 }
  0x35   :  { %p2073_p9 = por %p2072_p8, %p2071_p7 }
  0x37   :  { %p2074_p10 = pnand %p2073_p9, %p2067_p6 }
  0x39   :  { %2077 = shalt.err (!%p2074_p10)
}
  0x3a   :  { %81 = dma.hbm_to_vmem [thread:$0]  %s2331_s7, 4096, %s76_s15, [#allocation9], %s2107_s12, %s2107_s12, %s2108_s13  }
  0x3b   :  { %2098 = dma.done.wait [#allocation3], 128  }
  0x3c   :  { %2099 = vsyncadd [#allocation3], 4294967168 }
  0x3d   :  { %2100 = dma.done.wait [#allocation6], 2176  }
  0x3e   :  { %2101 = vsyncadd [#allocation6], 4294965120 }
  0x3f   :  { %2102 = dma.done.wait [#allocation9], 12288  }
  0x40   :  { %2103 = vsyncadd [#allocation9], 4294955008  ;;  %v2117_v0 = vmov 0.0   ;;  %vm2118_vm0 = vmmov 0   ;;  %v1793_v1 = vld [vmem:[#allocation5] sm:$0xff]   ;;  %v100_v2 = vld [vmem:[#allocation2] sm:$0xff] }
  0x41   :  { %1765 = vmatprep.subr.bf16.mxu0 %v2117_v0  ;;  %1767 = vmatprep.mubr.msk.bf16.mxu0 %vm2118_vm0, %v2117_v0  ;;  %v101_v3 = vpack.c.bf16 %v100_v2, %v100_v2  ;;  %vm117_vm1 = vcmask 130048   ;;  %v1794_v4 = vld [vmem:[#allocation7 + $0x74] ss:$8 sps:$4 sm:$0xff]   ;;  %v1796_v5 = vld [vmem:[#allocation7 + $0x70] ss:$8 sps:$4 sm:$0xff]   ;;  %v2119_v20 = vmov 0  }
  0x42   :  { %1766 = vmatpush3.bf16.msra.mxu0 %v1793_v1  ;;  %v1797_v6 = vld [vmem:[#allocation7 + $0x64] ss:$8 sps:$4 sm:$0xff]   ;;  %271 = vmatprep.subr.bf16.mxu1 %v1794_v4  ;;  %v1799_v7 = vld [vmem:[#allocation7 + $0x60] ss:$8 sps:$4 sm:$0xff]   ;;  %v1800_v8 = vld [vmem:[#allocation7 + $0x54] ss:$8 sps:$4 sm:$0xff]  }
  0x43   :  { %272 = vmatpush1.bf16.msra.mxu1 %v1796_v5  ;;  %v1802_v9 = vld [vmem:[#allocation7 + $0x50] ss:$8 sps:$4 sm:$0xff]   ;;  %v1803_v10 = vld [vmem:[#allocation7 + $0x44] ss:$8 sps:$4 sm:$0xff]   ;;  %v1805_v11 = vld [vmem:[#allocation7 + $0x40] ss:$8 sps:$4 sm:$0xff]   ;;  %303 = vmatprep.mubr.bf16.mxu1 %v2119_v20 }
  0x44   :  { %273 = vmatprep.subr.bf16.mxu1 %v1797_v6  ;;  %v1806_v12 = vld [vmem:[#allocation7 + $0x34] ss:$8 sps:$4 sm:$0xff]   ;;  %v1808_v13 = vld [vmem:[#allocation7 + $0x30] ss:$8 sps:$4 sm:$0xff]   ;;  %v1809_v14 = vld [vmem:[#allocation7 + $0x24] ss:$8 sps:$4 sm:$0xff]  }
  0x45   :  { %1768 = vmatmul.mubr.msk.bf16.vlgmr.msra.gmra.mxu0 %vm117_vm1, %v101_v3  ;;  %v1811_v15 = vld [vmem:[#allocation7 + $0x20] ss:$8 sps:$4 sm:$0xff]   ;;  %v1812_v16 = vld [vmem:[#allocation7 + $0x14] ss:$8 sps:$4 sm:$0xff]   ;;  %v1814_v17 = vld [vmem:[#allocation7 + $0x10] ss:$8 sps:$4 sm:$0xff]  }
  0x46   :  { %v1815_v18 = vld [vmem:[#allocation7 + $0x4] ss:$8 sps:$4 sm:$0xff]   ;;  %v1817_v19 = vld [vmem:[#allocation7] ss:$8 sps:$4 sm:$0xff]   ;;  %v1603_v50 = vld [vmem:[%s2326_s2] ss:$0 sm:$0xff] }
  0x47   :  { %274 = vmatpush1.bf16.msra.mxu1 %v1799_v7  ;;  %v1818_v21 = vld [vmem:[#allocation8 + $0xe0] ss:$16 sps:$4 sm:$0xff]   ;;  %v1820_v22 = vld [vmem:[#allocation8 + $0xe4] ss:$16 sps:$4 sm:$0xff]   ;;  %v1823_v23 = vld [vmem:[#allocation8 + $0xec] ss:$16 sps:$4 sm:$0xff]  }
  0x48   :  { %275 = vmatprep.subr.bf16.mxu1 %v1800_v8  ;;  %v1826_v24 = vld [vmem:[#allocation8 + $0xc4] ss:$16 sps:$4 sm:$0xff]   ;;  %722 = vmatprep.subr.bf16.mxu0 %v1820_v22  ;;  %v1824_v25 = vld [vmem:[#allocation8 + $0xc0] ss:$16 sps:$4 sm:$0xff]   ;;  %v1821_v56 = vld [vmem:[#allocation8 + $0xe8] ss:$16 sps:$4 sm:$0xff]  }
  0x49   :  { %723 = vmatpush1.bf16.msra.mxu0 %v1818_v21  ;;  %v1832_v26 = vld [vmem:[#allocation8 + $0xa4] ss:$16 sps:$4 sm:$0xff]   ;;  %v1830_v27 = vld [vmem:[#allocation8 + $0xa0] ss:$16 sps:$4 sm:$0xff]   ;;  %v1829_v58 = vld [vmem:[#allocation8 + $0xcc] ss:$16 sps:$4 sm:$0xff]  }
  0x4a   :  { %724 = vmatprep.subr.bf16.mxu0 %v1826_v24  ;;  %v1838_v28 = vld [vmem:[#allocation8 + $0x84] ss:$16 sps:$4 sm:$0xff]   ;;  %v1836_v29 = vld [vmem:[#allocation8 + $0x80] ss:$16 sps:$4 sm:$0xff]   ;;  %v1827_v60 = vld [vmem:[#allocation8 + $0xc8] ss:$16 sps:$4 sm:$0xff]  }
  0x4b   :  { %276 = vmatpush1.bf16.msra.mxu1 %v1802_v9  ;;  %v1844_v30 = vld [vmem:[#allocation8 + $0x64] ss:$16 sps:$4 sm:$0xff]   ;;  %v1842_v31 = vld [vmem:[#allocation8 + $0x60] ss:$16 sps:$4 sm:$0xff]   ;;  %v1835_v61 = vld [vmem:[#allocation8 + $0xac] ss:$16 sps:$4 sm:$0xff]  }
  0x4c   :  { %277 = vmatprep.subr.bf16.mxu1 %v1803_v10  ;;  %v1850_v32 = vld [vmem:[#allocation8 + $0x44] ss:$16 sps:$4 sm:$0xff]   ;;  %v1848_v33 = vld [vmem:[#allocation8 + $0x40] ss:$16 sps:$4 sm:$0xff]   ;;  %v1833_v62 = vld [vmem:[#allocation8 + $0xa8] ss:$16 sps:$4 sm:$0xff]  }
  0x4d   :  { %725 = vmatpush1.bf16.msra.mxu0 %v1824_v25  ;;  %v1856_v34 = vld [vmem:[#allocation8 + $0x24] ss:$16 sps:$4 sm:$0xff]   ;;  %v1854_v35 = vld [vmem:[#allocation8 + $0x20] ss:$16 sps:$4 sm:$0xff]   ;;  %v1841_v63 = vld [vmem:[#allocation8 + $0x8c] ss:$16 sps:$4 sm:$0xff]  }
  0x4e   :  { %726 = vmatprep.subr.bf16.mxu0 %v1832_v26  ;;  %v1862_v36 = vld [vmem:[#allocation8 + $0x4] ss:$16 sps:$4 sm:$0xff]   ;;  %v1860_v37 = vld [vmem:[#allocation8] ss:$16 sps:$4 sm:$0xff]   ;;  %v1839_v1 = vld [vmem:[#allocation8 + $0x88] ss:$16 sps:$4 sm:$0xff]  }
  0x4f   :  { %278 = vmatpush1.bf16.msra.mxu1 %v1805_v11  ;;  %v1868_v38 = vld [vmem:[#allocation8 + $0x1e4] ss:$16 sps:$4 sm:$0xff]   ;;  %v1866_v39 = vld [vmem:[#allocation8 + $0x1e0] ss:$16 sps:$4 sm:$0xff]   ;;  %v1847_v2 = vld [vmem:[#allocation8 + $0x6c] ss:$16 sps:$4 sm:$0xff]  }
  0x50   :  { %279 = vmatprep.subr.bf16.mxu1 %v1806_v12  ;;  %v1874_v40 = vld [vmem:[#allocation8 + $0x1c4] ss:$16 sps:$4 sm:$0xff]   ;;  %v1872_v41 = vld [vmem:[#allocation8 + $0x1c0] ss:$16 sps:$4 sm:$0xff]   ;;  %v1845_v3 = vld [vmem:[#allocation8 + $0x68] ss:$16 sps:$4 sm:$0xff]  }
  0x51   :  { %727 = vmatpush1.bf16.msra.mxu0 %v1830_v27  ;;  %v1880_v42 = vld [vmem:[#allocation8 + $0x1a4] ss:$16 sps:$4 sm:$0xff]   ;;  %v1878_v43 = vld [vmem:[#allocation8 + $0x1a0] ss:$16 sps:$4 sm:$0xff]   ;;  %v1853_v4 = vld [vmem:[#allocation8 + $0x4c] ss:$16 sps:$4 sm:$0xff]  }
  0x52   :  { %728 = vmatprep.subr.bf16.mxu0 %v1838_v28  ;;  %v1886_v44 = vld [vmem:[#allocation8 + $0x184] ss:$16 sps:$4 sm:$0xff]   ;;  %v1884_v45 = vld [vmem:[#allocation8 + $0x180] ss:$16 sps:$4 sm:$0xff]   ;;  %v1851_v5 = vld [vmem:[#allocation8 + $0x48] ss:$16 sps:$4 sm:$0xff]  }
  0x53   :  { %280 = vmatpush1.bf16.msra.mxu1 %v1808_v13  ;;  %v1892_v46 = vld [vmem:[#allocation8 + $0x164] ss:$16 sps:$4 sm:$0xff]   ;;  %v1890_v47 = vld [vmem:[#allocation8 + $0x160] ss:$16 sps:$4 sm:$0xff]   ;;  %v1859_v6 = vld [vmem:[#allocation8 + $0x2c] ss:$16 sps:$4 sm:$0xff]  }
  0x54   :  { %281 = vmatprep.subr.bf16.mxu1 %v1809_v14  ;;  %v1898_v48 = vld [vmem:[#allocation8 + $0x144] ss:$16 sps:$4 sm:$0xff]   ;;  %v1896_v49 = vld [vmem:[#allocation8 + $0x140] ss:$16 sps:$4 sm:$0xff]   ;;  %v1857_v7 = vld [vmem:[#allocation8 + $0x28] ss:$16 sps:$4 sm:$0xff]  }
  0x55   :  { %729 = vmatpush1.bf16.msra.mxu0 %v1836_v29  ;;  %v1865_v8 = vld [vmem:[#allocation8 + $0xc] ss:$16 sps:$4 sm:$0xff]   ;;  %v1863_v9 = vld [vmem:[#allocation8 + $0x8] ss:$16 sps:$4 sm:$0xff]   ;;  %v1904_v22 = vld [vmem:[#allocation8 + $0x124] ss:$16 sps:$4 sm:$0xff]  }
  0x56   :  { %730 = vmatprep.subr.bf16.mxu0 %v1844_v30  ;;  %v1871_v10 = vld [vmem:[#allocation8 + $0x1ec] ss:$16 sps:$4 sm:$0xff]   ;;  %v1869_v11 = vld [vmem:[#allocation8 + $0x1e8] ss:$16 sps:$4 sm:$0xff]   ;;  %v1902_v24 = vld [vmem:[#allocation8 + $0x120] ss:$16 sps:$4 sm:$0xff]  }
  0x57   :  { %282 = vmatpush1.bf16.msra.mxu1 %v1811_v15  ;;  %v1877_v12 = vld [vmem:[#allocation8 + $0x1cc] ss:$16 sps:$4 sm:$0xff]   ;;  %v1875_v13 = vld [vmem:[#allocation8 + $0x1c8] ss:$16 sps:$4 sm:$0xff]   ;;  %v1910_v26 = vld [vmem:[#allocation8 + $0x104] ss:$16 sps:$4 sm:$0xff]  }
  0x58   :  { %283 = vmatprep.subr.bf16.mxu1 %v1812_v16  ;;  %v1883_v14 = vld [vmem:[#allocation8 + $0x1ac] ss:$16 sps:$4 sm:$0xff]   ;;  %v1881_v15 = vld [vmem:[#allocation8 + $0x1a8] ss:$16 sps:$4 sm:$0xff]   ;;  %v1908_v28 = vld [vmem:[#allocation8 + $0x100] ss:$16 sps:$4 sm:$0xff]  }
  0x59   :  { %731 = vmatpush1.bf16.msra.mxu0 %v1842_v31  ;;  %v1889_v16 = vld [vmem:[#allocation8 + $0x18c] ss:$16 sps:$4 sm:$0xff]   ;;  %v1899_v21 = vld [vmem:[#allocation8 + $0x148] ss:$16 sps:$4 sm:$0xff]   ;;  %s2120_s19 = smov 104   ;;  %s2121_s21 = smov 120  }
  0x5a   :  { %732 = vmatprep.subr.bf16.mxu0 %v1850_v32  ;;  %v1901_v20 = vld [vmem:[#allocation8 + $0x14c] ss:$16 sps:$4 sm:$0xff]   ;;  %v1905_v25 = vld [vmem:[#allocation8 + $0x128] ss:$16 sps:$4 sm:$0xff]   ;;  %v181_v32 = vlaneseq  ;;  %s2122_s22 = smov 112   ;;  %vm1337_vm2 = vcmask 60416  }
  0x5b   :  { %284 = vmatpush1.bf16.msra.mxu1 %v1814_v17  ;;  %v1887_v17 = vld [vmem:[#allocation8 + $0x188] ss:$16 sps:$4 sm:$0xff]   ;;  %v1913_v27 = vld [vmem:[#allocation8 + $0x10c] ss:$16 sps:$4 sm:$0xff]   ;;  %vm1579_vm3 = vcmask 64512   ;;  %s2127_s23 = smov [#allocation11]  }
  0x5c   :  { %285 = vmatprep.subr.bf16.mxu1 %v1815_v18  ;;  %v1895_v18 = vld [vmem:[#allocation8 + $0x16c] ss:$16 sps:$4 sm:$0xff]   ;;  %v1911_v29 = vld [vmem:[#allocation8 + $0x108] ss:$16 sps:$4 sm:$0xff]   ;;  %s1592_s24 = sshll.u32 %s2127_s23, 4  ;;  %vm1582_vm4 = vcmask 195584   ;;  %s1593_s24 = int_to_ptr.vmem [resolvable:$true] %s1592_s24 }
  0x5d   :  { %733 = vmatpush1.bf16.msra.mxu0 %v1848_v33  ;;  %v1914_v30 = vld [vmem:[#allocation10 + $0x78] sm:$0xff]   ;;  %v2207_v33 = vshrl.u32 %v181_v32, 7  ;;  %vm1584_vm5 = vcmask 261120   ;;  %p2083_p12 = scmp.lt.s32.totalorder %s1593_s24, %s1593_s24 }
  0x5e   :  { %734 = vmatprep.subr.bf16.mxu0 %v1856_v34  ;;  %v1915_v31 = vld [vmem:[#allocation10 + $0xf8] sm:$0xff]  }
  0x5f   :  { %286 = vmatpush1.bf16.msra.mxu1 %v1817_v19  ;;  %v1893_v19 = vld [vmem:[#allocation8 + $0x168] ss:$16 sps:$4 sm:$0xff]   ;;  %v2210_v34 = vsub.s32 0, %v2207_v33 }
  0x60   :  { %763 = vmatprep.subr.bf16.mxu1 %v1823_v23  ;;  %v1907_v23 = vld [vmem:[#allocation8 + $0x12c] ss:$16 sps:$4 sm:$0xff]  }
  0x61   :  { %735 = vmatpush1.bf16.msra.mxu0 %v1854_v35  ;;  %v179_v35 = vld [vmem:[%s2328_s4] sm:$0x3] }
  0x62   :  { %736 = vmatprep.subr.bf16.mxu0 %v1862_v36  ;;  %v187_v36 = vsub.s32 1, %v2207_v33 }
  0x65   :  { %737 = vmatpush1.bf16.msra.mxu0 %v1860_v37  ;;  %v184_v37 = vrot.slane %v179_v35, %v2210_v34 }
  0x66   :  { %738 = vmatprep.subr.bf16.mxu0 %v1868_v38  ;;  %v188_v38 = vrot.slane %v179_v35, %v187_v36 }
  0x69   :  { %739 = vmatpush2.bf16.msra.mxu0 %v1866_v39 }
  0x6a   :  { %740 = vmatprep.subr.bf16.mxu0 %v1874_v40 }
  0x6d   :  { %741 = vmatpush2.bf16.msra.mxu0 %v1872_v41 }
  0x6e   :  { %742 = vmatprep.subr.bf16.mxu0 %v1880_v42 }
  0x71   :  { %743 = vmatpush2.bf16.msra.mxu0 %v1878_v43 }
  0x72   :  { %744 = vmatprep.subr.bf16.mxu0 %v1886_v44 }
  0x75   :  { %745 = vmatpush2.bf16.msra.mxu0 %v1884_v45 }
  0x76   :  { %746 = vmatprep.subr.bf16.mxu0 %v1892_v46 }
  0x79   :  { %747 = vmatpush2.bf16.msra.mxu0 %v1890_v47 }
  0x7a   :  { %748 = vmatprep.subr.bf16.mxu0 %v1898_v48  ;;  %v1916_v48 = vld [vmem:[#allocation10 + $0x38] sm:$0xff]  }
  0x7d   :  { %749 = vmatpush2.bf16.msra.mxu0 %v1896_v49  ;;  %v1917_v49 = vld [vmem:[#allocation10 + $0xb8] sm:$0xff]  }
  0x7e   :  { %750 = vmatprep.subr.bf16.mxu0 %v1904_v22 }
  0x81   :  { %751 = vmatpush2.bf16.msra.mxu0 %v1902_v24 }
  0x82   :  { %752 = vmatprep.subr.bf16.mxu0 %v1910_v26 }
  0x85   :  { %753 = vmatpush2.bf16.msra.mxu0 %v1908_v28 }
  0x86   :  { %1721 = vmatprep.subr.bf16.mxu0 %v1914_v30 }
 0x105   :  { %v155_v51 = vpop.f32.mrf.mxu0 }
 0x106   :  { %v156_v52 = vadd.f32 %v1603_v50, %v155_v51  ;;  %v1918_v51 = vld [vmem:[#allocation10 + $0x70] sm:$0xff]  }
 0x107   :  { %v1769_v53 = vpop.f32.mrf.mxu0 }
 0x108   :  { %v161_v54 = vmax.f32 %v156_v52, 0.0  ;;  %v1919_v52 = vld [vmem:[#allocation10 + $0xf0] sm:$0xff]  }
 0x109   :  { %v158_v55 = vpop.f32.mrf.mxu0  ;;  %v1920_v53 = vld [vmem:[#allocation10 + $0x30] sm:$0xff]  }
 0x10a   :  { %v162_v57 = vpack.c.bf16 %v161_v54, %v161_v54  ;;  %v1921_v54 = vld [vmem:[#allocation10 + $0xb0] sm:$0xff]   ;;  %v1922_v55 = vld [vmem:[#allocation10 + $0x68] sm:$0xff]  }
 0x10b   :  { %v1770_v59 = vpop.f32.mrf.mxu0 }
 0x10c   :  { %304 = vmatmul.mubr.bf16.vlgmr.msra.gmra.mxu1 %v162_v57  ;;  %v1924_v57 = vld [vmem:[#allocation10 + $0x28] sm:$0xff]   ;;  %v1926_v59 = vld [vmem:[#allocation10 + $0x60] sm:$0xff]  }
 0x10d   :  { %764 = vmatpush1.bf16.msra.mxu1 %v1821_v56  ;;  %v1923_v56 = vld [vmem:[#allocation10 + $0xe8] sm:$0xff]  }
 0x10e   :  { %765 = vmatprep.subr.bf16.mxu1 %v1829_v58  ;;  %v1925_v58 = vld [vmem:[#allocation10 + $0xa8] sm:$0xff]  }
 0x111   :  { %766 = vmatpush1.bf16.msra.mxu1 %v1827_v60  ;;  %v1927_v60 = vld [vmem:[#allocation10 + $0xe0] sm:$0xff]  }
 0x112   :  { %767 = vmatprep.subr.bf16.mxu1 %v1835_v61  ;;  %v1928_v61 = vld [vmem:[#allocation10 + $0x20] sm:$0xff]  }
 0x115   :  { %768 = vmatpush1.bf16.msra.mxu1 %v1833_v62  ;;  %v1929_v62 = vld [vmem:[#allocation10 + $0xa0] sm:$0xff]  }
 0x116   :  { %769 = vmatprep.subr.bf16.mxu1 %v1841_v63  ;;  %v1930_v63 = vld [vmem:[#allocation10 + $0x58] sm:$0xff]  }
 0x119   :  { %770 = vmatpush1.bf16.msra.mxu1 %v1839_v1  ;;  %v1931_v1 = vld [vmem:[#allocation10 + $0xd8] sm:$0xff]  }
 0x11a   :  { %771 = vmatprep.subr.bf16.mxu1 %v1847_v2  ;;  %v1932_v2 = vld [vmem:[#allocation10 + $0x18] sm:$0xff]  }
 0x11d   :  { %772 = vmatpush1.bf16.msra.mxu1 %v1845_v3  ;;  %v1933_v3 = vld [vmem:[#allocation10 + $0x98] sm:$0xff]  }
 0x11e   :  { %773 = vmatprep.subr.bf16.mxu1 %v1853_v4  ;;  %v1934_v4 = vld [vmem:[#allocation10 + $0x50] sm:$0xff]  }
 0x121   :  { %774 = vmatpush1.bf16.msra.mxu1 %v1851_v5  ;;  %v1935_v5 = vld [vmem:[#allocation10 + $0xd0] sm:$0xff]  }
 0x122   :  { %775 = vmatprep.subr.bf16.mxu1 %v1859_v6  ;;  %v1936_v6 = vld [vmem:[#allocation10 + $0x10] sm:$0xff]  }
 0x125   :  { %776 = vmatpush1.bf16.msra.mxu1 %v1857_v7  ;;  %v1937_v7 = vld [vmem:[#allocation10 + $0x90] sm:$0xff]  }
 0x126   :  { %777 = vmatprep.subr.bf16.mxu1 %v1865_v8  ;;  %v1938_v8 = vld [vmem:[#allocation10 + $0x48] sm:$0xff]  }
 0x129   :  { %778 = vmatpush1.bf16.msra.mxu1 %v1863_v9  ;;  %v1939_v9 = vld [vmem:[#allocation10 + $0xc8] sm:$0xff]  }
 0x12a   :  { %779 = vmatprep.subr.bf16.mxu1 %v1871_v10  ;;  %v1940_v10 = vld [vmem:[#allocation10 + $0x8] sm:$0xff]  }
 0x12d   :  { %780 = vmatpush2.bf16.msra.mxu1 %v1869_v11  ;;  %v1941_v11 = vld [vmem:[#allocation10 + $0x88] sm:$0xff]  }
 0x12e   :  { %781 = vmatprep.subr.bf16.mxu1 %v1877_v12  ;;  %v1942_v12 = vld [vmem:[#allocation10 + $0x40] sm:$0xff]  }
 0x131   :  { %782 = vmatpush2.bf16.msra.mxu1 %v1875_v13  ;;  %v1943_v13 = vld [vmem:[#allocation10 + $0xc0] sm:$0xff]  }
 0x132   :  { %783 = vmatprep.subr.bf16.mxu1 %v1883_v14  ;;  %v1944_v14 = vld [vmem:[#allocation10] sm:$0xff]  }
 0x135   :  { %784 = vmatpush2.bf16.msra.mxu1 %v1881_v15  ;;  %v1945_v15 = vld [vmem:[#allocation10 + $0x80] sm:$0xff]  }
 0x136   :  { %785 = vmatprep.subr.bf16.mxu1 %v1889_v16  ;;  %v392_v16 = vsub.s32 2, %v2207_v33 }
 0x139   :  { %786 = vmatpush2.bf16.msra.mxu1 %v1887_v17  ;;  %v380_v17 = vld [vmem:[%s2330_s6] sm:$0xf] }
 0x13a   :  { %787 = vmatprep.subr.bf16.mxu1 %v1895_v18  ;;  %v396_v18 = vsub.s32 3, %v2207_v33 }
 0x13c   :  { %v397_v22 = vrot.slane %v380_v17, %v396_v18 }
 0x13d   :  { %788 = vmatpush2.bf16.msra.mxu1 %v1893_v19  ;;  %v385_v19 = vrot.slane %v380_v17, %v2210_v34 }
 0x13e   :  { %789 = vmatprep.subr.bf16.mxu1 %v1901_v20  ;;  %v393_v20 = vrot.slane %v380_v17, %v392_v16 }
 0x141   :  { %790 = vmatpush2.bf16.msra.mxu1 %v1899_v21  ;;  %v389_v21 = vrot.slane %v380_v17, %v187_v36 }
 0x142   :  { %791 = vmatprep.subr.bf16.mxu1 %v1907_v23 }
 0x145   :  { %792 = vmatpush2.bf16.msra.mxu1 %v1905_v25 }
 0x146   :  { %793 = vmatprep.subr.bf16.mxu1 %v1913_v27 }
 0x149   :  { %794 = vmatpush2.bf16.msra.mxu1 %v1911_v29 }
 0x14a   :  { %1743 = vmatprep.subr.bf16.mxu1 %v1915_v31 }
 0x1cc   :  { %v305_v39 = vpop.f32.mrf.mxu1 }
 0x1cd   :  { %v306_v40 = vadd.f32 %v305_v39, %v184_v37 }
 0x1ce   :  { %v307_v41 = vpop.f32.mrf.mxu1 }
 0x1cf   :  { %v308_v42 = vadd.f32 %v307_v41, %v188_v38  ;;  %v312_v43 = vmax.f32 %v306_v40, 0.0 }
 0x1d0   :  { %v309_v44 = vpop.f32.mrf.mxu1 }
 0x1d1   :  { %v313_v45 = vmax.f32 %v308_v42, 0.0  ;;  %v314_v50 = vpack.c.bf16 %v312_v43, %v312_v43 }
 0x1d2   :  { %v310_v46 = vpop.f32.mrf.mxu1 }
 0x1d3   :  { %v315_v47 = vpack.c.bf16 %v313_v45, %v313_v45 }
 0x1d5   :  { %754 = vmatprep.mubr.bf16.mxu0 %v315_v47  ;;  %795 = vmatprep.mubr.bf16.mxu1 %v315_v47  ;;  %v1686_v47 = vld [vmem:[%s2332_s8] ss:$0 sm:$0xff]  ;;  %s2126_s8 = smov 24  }
 0x1d6   :  { %755 = vmatmul.mubr.bf16.vlgmr.msra.gmra.mxu0 %v314_v50  ;;  %796 = vmatmul.mubr.bf16.vlgmr.msra.gmra.mxu1 %v314_v50 }
 0x1d7   :  { %1722 = vmatpush3.bf16.msra.mxu0 %v1916_v48  ;;  %1744 = vmatpush3.bf16.msra.mxu1 %v1917_v49 }
 0x1d8   :  { %1723 = vmatprep.subr.bf16.mxu0 %v1918_v51  ;;  %1745 = vmatprep.subr.bf16.mxu1 %v1919_v52 }
 0x1db   :  { %1724 = vmatpush3.bf16.msra.mxu0 %v1920_v53  ;;  %1746 = vmatpush3.bf16.msra.mxu1 %v1921_v54 }
 0x1dc   :  { %1725 = vmatprep.subr.bf16.mxu0 %v1922_v55  ;;  %1747 = vmatprep.subr.bf16.mxu1 %v1923_v56 }
 0x1df   :  { %1726 = vmatpush3.bf16.msra.mxu0 %v1924_v57  ;;  %1748 = vmatpush3.bf16.msra.mxu1 %v1925_v58 }
 0x1e0   :  { %1727 = vmatprep.subr.bf16.mxu0 %v1926_v59  ;;  %1749 = vmatprep.subr.bf16.mxu1 %v1927_v60 }
 0x1e3   :  { %1728 = vmatpush3.bf16.msra.mxu0 %v1928_v61  ;;  %1750 = vmatpush3.bf16.msra.mxu1 %v1929_v62  ;;  %v2123_v61 = vmov 1966171168  }
 0x1e4   :  { %1729 = vmatprep.subr.bf16.mxu0 %v1930_v63  ;;  %1751 = vmatprep.subr.bf16.mxu1 %v1931_v1  ;;  %v1242_v62 = vunpack.c.l.s4 %v2123_v61 }
 0x1e6   :  { %v1243_v63 = vunpack.c.0.s8 %v1242_v62 }
 0x1e7   :  { %1730 = vmatpush3.bf16.msra.mxu0 %v1932_v2  ;;  %1752 = vmatpush3.bf16.msra.mxu1 %v1933_v3  ;;  %v2124_v2 = vmov 1983009808  }
 0x1e8   :  { %1731 = vmatprep.subr.bf16.mxu0 %v1934_v4  ;;  %1753 = vmatprep.subr.bf16.mxu1 %v1935_v5  ;;  %v1246_v1 = vsub.s32 %v1243_v63, %v2207_v33  ;;  %v1175_v3 = vunpack.c.l.s4 %v2124_v2  ;;  %v2125_v4 = vmov 1934713408  }
 0x1e9   :  { %v1207_v5 = vunpack.c.l.s4 %v2125_v4 }
 0x1eb   :  { %1732 = vmatpush3.bf16.msra.mxu0 %v1936_v6  ;;  %1754 = vmatpush3.bf16.msra.mxu1 %v1937_v7 }
 0x1ec   :  { %1733 = vmatprep.subr.bf16.mxu0 %v1938_v8  ;;  %1755 = vmatprep.subr.bf16.mxu1 %v1939_v9  ;;  %v1176_v8 = vunpack.c.0.s8 %v1175_v3 }
 0x1ef   :  { %1734 = vmatpush3.bf16.msra.mxu0 %v1940_v10  ;;  %1756 = vmatpush3.bf16.msra.mxu1 %v1941_v11  ;;  %v1208_v10 = vunpack.c.0.s8 %v1207_v5 }
 0x1f0   :  { %1735 = vmatprep.subr.bf16.mxu0 %v1942_v12  ;;  %1757 = vmatprep.subr.bf16.mxu1 %v1943_v13  ;;  %v2232_v13 = vsub.s32 %v1176_v8, %v2207_v33 }
 0x1f3   :  { %1736 = vmatpush3.bf16.msra.mxu0 %v1944_v14  ;;  %1758 = vmatpush3.bf16.msra.mxu1 %v1945_v15 }
 0x296   :  { %v756_v23 = vpop.f32.mrf.mxu0  ;;  %v797_v24 = vpop.f32.mrf.mxu1 }
 0x297   :  { %v757_v25 = vadd.f32 %v756_v23, %v385_v19  ;;  %v798_v26 = vadd.f32 %v797_v24, %v393_v20 }
 0x298   :  { %v758_v27 = vpop.f32.mrf.mxu0  ;;  %v799_v28 = vpop.f32.mrf.mxu1 }
 0x299   :  { %v759_v29 = vadd.f32 %v758_v27, %v389_v21  ;;  %v800_v30 = vadd.f32 %v799_v28, %v397_v22  ;;  %v804_v31 = vmax.f32 %v757_v25, 0.0  ;;  %v806_v32 = vmax.f32 %v798_v26, 0.0 }
 0x29a   :  { %v760_v35 = vpop.f32.mrf.mxu0  ;;  %v801_v37 = vpop.f32.mrf.mxu1  ;;  %v2235_v21 = vsub.s32 %v1208_v10, %v2207_v33 }
 0x29b   :  { %v805_v38 = vmax.f32 %v759_v29, 0.0  ;;  %v807_v39 = vmax.f32 %v800_v30, 0.0  ;;  %v808_v36 = vpack.c.bf16 %v804_v31, %v804_v31  ;;  %v810_v44 = vpack.c.bf16 %v806_v32, %v806_v32 }
 0x29c   :  { %v761_v40 = vpop.f32.mrf.mxu0  ;;  %v802_v41 = vpop.f32.mrf.mxu1 }
 0x29d   :  { %v809_v42 = vpack.c.bf16 %v805_v38, %v805_v38  ;;  %v811_v43 = vpack.c.bf16 %v807_v39, %v807_v39 }
 0x29f   :  { %1107 = vmatprep.mubr.bf16.mxu0 %v809_v42  ;;  %1147 = vmatprep.mubr.bf16.mxu1 %v811_v43 }
 0x2a0   :  { %1108 = vmatmul.mubr.bf16.vlgmr.msra.gmra.mxu0 %v808_v36  ;;  %1148 = vmatmul.mubr.bf16.vlgmr.msra.gmra.mxu1 %v810_v44 }
 0x360   :  { %v1737_v45 = vpop.f32.mrf.mxu0  ;;  %v1759_v46 = vpop.f32.mrf.mxu1 }
 0x362   :  { %v1738_v48 = vpop.f32.mrf.mxu0  ;;  %v1760_v49 = vpop.f32.mrf.mxu1 }
 0x363   :  { %v1739_v50 = vadd.f32 %v1738_v48, %v1737_v45  ;;  %v1761_v54 = vadd.f32 %v1760_v49, %v1759_v46 }
 0x364   :  { %v1740_v51 = vpop.f32.mrf.mxu0  ;;  %v1762_v52 = vpop.f32.mrf.mxu1 }
 0x365   :  { %v1110_v53 = vadd.f32 %v1739_v50, %v1686_v47 }
 0x366   :  { %v1741_v55 = vpop.f32.mrf.mxu0  ;;  %v1763_v56 = vpop.f32.mrf.mxu1 }
 0x367   :  { %v1150_v57 = vadd.f32 %v1761_v54, %v1110_v53 }
 0x369   :  { %1160 = vrot.lane.b32.xlu1 %v1150_v57, %s2120_s19  ;;  %1156 = vrot.lane.b32.xlu0 %v1150_v57, %s2121_s21  ;;  %v1247_v6 = vrot.slane %v1150_v57, %v1246_v1  ;;  %v1240_v7 = vcombine.high %v1150_v57, %v1150_v57 }
 0x36b   :  { %v1254_v11 = vrot.slane %v1240_v7, %v1246_v1  ;;  %v1255_v12 = vcombine.high %v1247_v6, %v1247_v6  ;;  %v1263_v16 = vrot.slane %v1247_v6, %v1246_v1 }
 0x36d   :  { %1158 = vrot.lane.b32.xlu0 %v1150_v57, %s2122_s22  ;;  %v1270_v22 = vrot.slane %v1254_v11, %v1246_v1  ;;  %v2237_v23 = vrot.slane %v1255_v12, %v1246_v1  ;;  %v1285_v28 = vcombine.high %v1263_v16, %v1263_v16  ;;  %v1256_v29 = vcombine.high %v1254_v11, %v1254_v11 }
 0x36e   :  { %v1292_v42 = vrot.slane %v1263_v16, %v2210_v34 }
 0x36f   :  { %v1287_v33 = vcombine.high %v2237_v23, %v2237_v23  ;;  %v1286_v40 = vcombine.high %v1270_v22, %v1270_v22  ;;  %v1308_v43 = vrot.slane %v1270_v22, %v2210_v34  ;;  %v1300_v36 = vrot.slane %v1285_v28, %v2210_v34 }
 0x370   :  { %v1296_v46 = vrot.slane %v2237_v23, %v2210_v34  ;;  %v2258_v47 = vrot.slane %v1256_v29, %v1246_v1 }
 0x371   :  { %v2262_v51 = vrot.slane %v1287_v33, %v2210_v34  ;;  %v2269_v55 = vrot.slane %v1286_v40, %v2210_v34 }
 0x3db   :  { %v1157_v58 = vpop.permute.xlu0 %1156  ;;  %v1161_v59 = vpop.permute.xlu1 %1160 }
 0x3dc   :  { %1162 = vrot.lane.b32.xlu1 %v1157_v58, %s2121_s21 }
 0x3df   :  { %v1159_v60 = vpop.permute.xlu0 %1158 }
 0x3e0   :  { %1166 = vrot.lane.b32.xlu1 %v1161_v59, %s2121_s21  ;;  %1164 = vrot.lane.b32.xlu0 %v1159_v60, %s2121_s21 }
 0x44e   :  { %v1163_v9 = vpop.permute.xlu1 %1162 }
 0x452   :  { %v1167_v14 = vpop.permute.xlu1 %1166  ;;  %v1165_v15 = vpop.permute.xlu0 %1164 }
 0x453   :  { %v1188_v17 = vcombine.low %v1163_v9, %v1167_v14  ;;  %v1189_v18 = vcombine.high %v1163_v9, %v1167_v14  ;;  %v1172_v19 = vcombine.low %v1157_v58, %v1165_v15  ;;  %v1173_v20 = vcombine.high %v1157_v58, %v1165_v15 }
 0x455   :  { %v1196_v24 = vrot.slane %v1188_v17, %v2232_v13  ;;  %v1203_v25 = vrot.slane %v1189_v18, %v2232_v13  ;;  %v1180_v26 = vrot.slane %v1172_v19, %v2232_v13  ;;  %v1187_v27 = vrot.slane %v1173_v20, %v2232_v13 }
 0x457   :  { %v1204_v30 = vcombine.low %v1180_v26, %v1196_v24  ;;  %v1205_v31 = vcombine.high %v1180_v26, %v1196_v24  ;;  %v1220_v32 = vcombine.low %v1187_v27, %v1203_v25  ;;  %v1221_v35 = vcombine.high %v1187_v27, %v1203_v25 }
 0x459   :  { %v1212_v37 = vrot.slane %v1204_v30, %v2235_v21  ;;  %v1219_v38 = vrot.slane %v1205_v31, %v2235_v21  ;;  %v1228_v39 = vrot.slane %v1220_v32, %v2235_v21  ;;  %v2249_v41 = vrot.slane %v1221_v35, %v2235_v21 }
 0x45b   :  { %v1338_v44 = vsel %vm1337_vm2, %v1212_v37, 0.0  ;;  %v1366_v45 = vsel %vm1337_vm2, %v1228_v39, 0.0  ;;  %v1352_v50 = vsel %vm1337_vm2, %v1219_v38, 0.0  ;;  %v1236_v53 = vcombine.high %v1212_v37, %v2117_v0 }
 0x45c   :  { %v1339_v48 = vrot.slane %v1338_v44, 4  ;;  %v1367_v49 = vrot.slane %v1366_v45, 4  ;;  %v1353_v52 = vrot.slane %v1352_v50, 4  ;;  %v2266_v54 = vcombine.high %v1219_v38, %v2117_v0 }
 0x45d   :  { %v1380_v58 = vsel %vm1337_vm2, %v2249_v41, 0.0  ;;  %v2274_v59 = vcombine.high %v1228_v39, %v2117_v0  ;;  %v1329_v60 = vadd.f32 %v1292_v42, %v1212_v37  ;;  %v1333_v61 = vadd.f32 %v1308_v43, %v1228_v39 }
 0x45e   :  { %v1340_v56 = vadd.f32 %v1339_v48, %v1338_v44  ;;  %v1368_v57 = vadd.f32 %v1367_v49, %v1366_v45  ;;  %v1354_v62 = vadd.f32 %v1353_v52, %v1352_v50  ;;  %v1345_v63 = vsel %vm1337_vm2, %v1236_v53, 0.0 }
 0x45f   :  { %v1346_v3 = vrot.slane %v1345_v63, 4  ;;  %v1359_v4 = vsel %vm1337_vm2, %v2266_v54, 0.0  ;;  %v1331_v5 = vadd.f32 %v1300_v36, %v1219_v38  ;;  %v1381_v8 = vrot.slane %v1380_v58, 4 }
 0x460   :  { %v1341_v1 = vrot.slane %v1340_v56, 2  ;;  %v1369_v2 = vrot.slane %v1368_v57, 2  ;;  %v1355_v6 = vrot.slane %v1354_v62, 2  ;;  %v1360_v7 = vrot.slane %v1359_v4, 4 }
 0x461   :  { %v1347_v11 = vadd.f32 %v1346_v3, %v1345_v63  ;;  %v1373_v12 = vsel %vm1337_vm2, %v2274_v59, 0.0  ;;  %v1382_v16 = vadd.f32 %v1381_v8, %v1380_v58  ;;  %v1239_v22 = vcombine.high %v2249_v41, %v2117_v0 }
 0x462   :  { %v1342_v9 = vadd.f32 %v1341_v1, %v1340_v56  ;;  %v1370_v10 = vadd.f32 %v1369_v2, %v1368_v57  ;;  %v1356_v14 = vadd.f32 %v1355_v6, %v1354_v62  ;;  %v1361_v15 = vadd.f32 %v1360_v7, %v1359_v4 }
 0x463   :  { %v1374_v17 = vrot.slane %v1373_v12, 4  ;;  %v1348_v20 = vrot.slane %v1347_v11, 2  ;;  %v1383_v25 = vrot.slane %v1382_v16, 2  ;;  %v1330_v29 = vadd.f32 %v1296_v46, %v1236_v53 }
 0x464   :  { %v1343_v18 = vrot.slane %v1342_v9, 1  ;;  %v1371_v19 = vrot.slane %v1370_v10, 1  ;;  %v1357_v23 = vrot.slane %v1356_v14, 1  ;;  %v1362_v24 = vrot.slane %v1361_v15, 2 }
 0x465   :  { %v1375_v26 = vadd.f32 %v1374_v17, %v1373_v12  ;;  %v1349_v30 = vadd.f32 %v1348_v20, %v1347_v11  ;;  %v1384_v35 = vadd.f32 %v1383_v25, %v1382_v16  ;;  %v1387_v40 = vsel %vm1337_vm2, %v1239_v22, 0.0 }
 0x466   :  { %v1344_v27 = vadd.f32 %v1343_v18, %v1342_v9  ;;  %v1372_v28 = vadd.f32 %v1371_v19, %v1370_v10  ;;  %v1358_v31 = vadd.f32 %v1357_v23, %v1356_v14  ;;  %v1363_v32 = vadd.f32 %v1362_v24, %v1361_v15 }
 0x467   :  { %v1376_v33 = vrot.slane %v1375_v26, 2  ;;  %v1350_v39 = vrot.slane %v1349_v30, 1  ;;  %v1385_v0 = vrot.slane %v1384_v35, 1  ;;  %v1388_v49 = vrot.slane %v1387_v40, 4 }
 0x468   :  { %v1395_v37 = vmul.f32 0.25, %v1344_v27  ;;  %v1399_v38 = vmul.f32 0.25, %v1372_v28  ;;  %v1397_v42 = vmul.f32 0.25, %v1358_v31  ;;  %v1364_v43 = vrot.slane %v1363_v32, 1 }
 0x469   :  { %v1377_v36 = vadd.f32 %v1376_v33, %v1375_v26  ;;  %v1351_v48 = vadd.f32 %v1350_v39, %v1349_v30  ;;  %v1386_v52 = vadd.f32 %v1385_v0, %v1384_v35  ;;  %v1389_v62 = vadd.f32 %v1388_v49, %v1387_v40 }
 0x46a   :  { %v1403_v44 = vsub.f32 %v1329_v60, %v1395_v37  ;;  %v1407_v45 = vsub.f32 %v1333_v61, %v1399_v38  ;;  %v1405_v50 = vsub.f32 %v1331_v5, %v1397_v42  ;;  %v1365_v46 = vadd.f32 %v1364_v43, %v1363_v32 }
 0x46b   :  { %v1378_v53 = vrot.slane %v1377_v36, 1  ;;  %v1396_v58 = vmul.f32 0.25, %v1351_v48  ;;  %v1332_v63 = vadd.f32 %v2262_v51, %v2266_v54  ;;  %v1401_v60 = vmul.f32 0.25, %v1386_v52 }
 0x46c   :  { %v1411_v56 = vsel %vm1337_vm2, %v1403_v44, -inf  ;;  %v1423_v57 = vsel %vm1337_vm2, %v1407_v45, -inf  ;;  %v1398_v1 = vmul.f32 0.25, %v1365_v46  ;;  %v1335_v3 = vadd.f32 %v2269_v55, %v2249_v41 }
 0x46d   :  { %1412 = vmax.xlane.f32.xlu0 %v1411_v56  ;;  %1424 = vmax.xlane.f32.xlu1 %v1423_v57  ;;  %v1379_v61 = vadd.f32 %v1378_v53, %v1377_v36  ;;  %v1404_v2 = vsub.f32 %v1330_v29, %v1396_v58  ;;  %v1390_v4 = vrot.slane %v1389_v62, 2  ;;  %v1417_v5 = vsel %vm1337_vm2, %v1405_v50, -inf }
 0x46e   :  { %v1406_v6 = vsub.f32 %v1332_v63, %v1398_v1  ;;  %v1312_v7 = vrot.slane %v2258_v47, %v2210_v34  ;;  %v1288_v8 = vcombine.high %v2258_v47, %v2258_v47  ;;  %v1409_v51 = vsub.f32 %v1335_v3, %v1401_v60 }
 0x46f   :  { %v1414_v9 = vsel %vm1337_vm2, %v1404_v2, -inf  ;;  %v1400_v54 = vmul.f32 0.25, %v1379_v61  ;;  %v1391_v10 = vadd.f32 %v1390_v4, %v1389_v62 }
 0x470   :  { %v1334_v11 = vadd.f32 %v1312_v7, %v2274_v59  ;;  %v1320_v55 = vrot.slane %v1288_v8, %v2210_v34  ;;  %v1420_v12 = vsel %vm1337_vm2, %v1406_v6, -inf  ;;  %v1429_v14 = vsel %vm1337_vm2, %v1409_v51, -inf }
 0x471   :  { %1418 = vmax.xlane.f32.xlu0 %v1417_v5  ;;  %1415 = vmax.xlane.f32.xlu1 %v1414_v9  ;;  %v1392_v41 = vrot.slane %v1391_v10, 1 }
 0x472   :  { %v1408_v15 = vsub.f32 %v1334_v11, %v1400_v54  ;;  %v1336_v47 = vadd.f32 %v1320_v55, %v1239_v22 }
 0x473   :  { %v1393_v16 = vadd.f32 %v1392_v41, %v1391_v10 }
 0x474   :  { %v1426_v18 = vsel %vm1337_vm2, %v1408_v15, -inf }
 0x475   :  { %1421 = vmax.xlane.f32.xlu0 %v1420_v12  ;;  %1430 = vmax.xlane.f32.xlu1 %v1429_v14  ;;  %v1402_v17 = vmul.f32 0.25, %v1393_v16 }
 0x477   :  { %v1410_v19 = vsub.f32 %v1336_v47, %v1402_v17 }
 0x479   :  { %1427 = vmax.xlane.f32.xlu0 %v1426_v18  ;;  %v1432_v20 = vsel %vm1337_vm2, %v1410_v19, -inf }
 0x47d   :  { %1433 = vmax.xlane.f32.xlu0 %v1432_v20 }
 0x4f6   :  { %v1413_v59 = vpop.xlane.xlu0 %1412  ;;  %v1425_v23 = vpop.xlane.xlu1 %1424 }
 0x4f7   :  { %v1435_v34 = vsub.f32 %v1403_v44, %v1413_v59  ;;  %v1439_v25 = vsub.f32 %v1407_v45, %v1425_v23 }
 0x4f9   :  { %v1443_v24 = vmul.f32 1.442695, %v1435_v34  ;;  %v1451_v30 = vmul.f32 1.442695, %v1439_v25 }
 0x4fa   :  { %v1419_v26 = vpop.xlane.xlu0 %1418  ;;  %v1416_v27 = vpop.xlane.xlu1 %1415 }
 0x4fb   :  { %1946 = vpow2.f32 %v1443_v24  ;;  %v1437_v28 = vsub.f32 %v1405_v50, %v1419_v26  ;;  %v1436_v29 = vsub.f32 %v1404_v2, %v1416_v27 }
 0x4fd   :  { %v1447_v22 = vmul.f32 1.442695, %v1437_v28  ;;  %v1445_v31 = vmul.f32 1.442695, %v1436_v29 }
 0x4fe   :  { %v1422_v32 = vpop.xlane.xlu0 %1421  ;;  %v1431_v35 = vpop.xlane.xlu1 %1430 }
 0x4ff   :  { %1948 = vpow2.f32 %v1447_v22  ;;  %v1438_v33 = vsub.f32 %v1406_v6, %v1422_v32  ;;  %v1441_v37 = vsub.f32 %v1409_v51, %v1431_v35 }
 0x500   :  { %1950 = vpow2.f32 %v1445_v31 }
 0x501   :  { %1952 = vpow2.f32 %v1451_v30  ;;  %v1449_v38 = vmul.f32 1.442695, %v1438_v33  ;;  %v1455_v39 = vmul.f32 1.442695, %v1441_v37 }
 0x502   :  { %v1428_v40 = vpop.xlane.xlu0 %1427 }
 0x503   :  { %1954 = vpow2.f32 %v1449_v38  ;;  %v1440_v42 = vsub.f32 %v1408_v15, %v1428_v40 }
 0x504   :  { %1956 = vpow2.f32 %v1455_v39 }
 0x505   :  { %v1453_v43 = vmul.f32 1.442695, %v1440_v42 }
 0x506   :  { %v1434_v0 = vpop.xlane.xlu0 %1433 }
 0x507   :  { %1958 = vpow2.f32 %v1453_v43  ;;  %v1442_v36 = vsub.f32 %v1410_v19, %v1434_v0 }
 0x508   :  { %v1947_v44 = vpop.eup %1946 }
 0x509   :  { %v1457_v45 = vmul.f32 1.442695, %v1442_v36  ;;  %v1459_v48 = vsel %vm1337_vm2, %v1947_v44, 0.0 }
 0x50a   :  { %1460 = vadd.xlane.f32.xlu1 %v1459_v48 }
 0x50b   :  { %1960 = vpow2.f32 %v1457_v45 }
 0x50c   :  { %v1949_v49 = vpop.eup %1948 }
 0x50d   :  { %v1951_v50 = vpop.eup %1950  ;;  %v1465_v46 = vsel %vm1337_vm2, %v1949_v49, 0.0 }
 0x50e   :  { %v1953_v52 = vpop.eup %1952  ;;  %1466 = vadd.xlane.f32.xlu1 %v1465_v46  ;;  %v1462_v53 = vsel %vm1337_vm2, %v1951_v50, 0.0 }
 0x50f   :  { %1463 = vadd.xlane.f32.xlu0 %v1462_v53  ;;  %v1471_v57 = vsel %vm1337_vm2, %v1953_v52, 0.0 }
 0x510   :  { %v1955_v56 = vpop.eup %1954 }
 0x511   :  { %v1468_v58 = vsel %vm1337_vm2, %v1955_v56, 0.0  ;;  %v1957_v62 = vpop.eup %1956 }
 0x512   :  { %1472 = vadd.xlane.f32.xlu1 %v1471_v57  ;;  %v1477_v1 = vsel %vm1337_vm2, %v1957_v62, 0.0 }
 0x513   :  { %1469 = vadd.xlane.f32.xlu0 %v1468_v58 }
 0x514   :  { %v1959_v63 = vpop.eup %1958 }
 0x515   :  { %v1474_v60 = vsel %vm1337_vm2, %v1959_v63, 0.0 }
 0x516   :  { %1478 = vadd.xlane.f32.xlu1 %v1477_v1 }
 0x517   :  { %1475 = vadd.xlane.f32.xlu0 %v1474_v60 }
 0x518   :  { %v1961_v61 = vpop.eup %1960 }
 0x519   :  { %v1480_v2 = vsel %vm1337_vm2, %v1961_v61, 0.0 }
 0x51b   :  { %1481 = vadd.xlane.f32.xlu0 %v1480_v2 }
 0x593   :  { %v1461_v3 = vpop.xlane.xlu1 %1460 }
 0x597   :  { %v1467_v4 = vpop.xlane.xlu1 %1466 }
 0x598   :  { %v1464_v5 = vpop.xlane.xlu0 %1463  ;;  %1962 = vrcp.f32 %v1467_v4 }
 0x599   :  { %1964 = vrcp.f32 %v1464_v5 }
 0x59b   :  { %v1473_v6 = vpop.xlane.xlu1 %1472 }
 0x59c   :  { %v1470_v7 = vpop.xlane.xlu0 %1469 }
 0x59d   :  { %1966 = vrcp.f32 %v1470_v7 }
 0x59e   :  { %1968 = vrcp.f32 %v1461_v3 }
 0x59f   :  { %v1479_v8 = vpop.xlane.xlu1 %1478 }
 0x5a0   :  { %1970 = vrcp.f32 %v1479_v8  ;;  %v1476_v9 = vpop.xlane.xlu0 %1475 }
 0x5a1   :  { %1972 = vrcp.f32 %v1473_v6 }
 0x5a2   :  { %1974 = vrcp.f32 %v1476_v9 }
 0x5a4   :  { %v1482_v51 = vpop.xlane.xlu0 %1481 }
 0x5a5   :  { %1976 = vrcp.f32 %v1482_v51  ;;  %v1963_v54 = vpop.eup %1962 }
 0x5a6   :  { %v1965_v10 = vpop.eup %1964  ;;  %v1488_v15 = vmul.f32 %v1963_v54, %v1949_v49 }
 0x5a7   :  { %v1486_v14 = vmul.f32 %v1965_v10, %v1951_v50 }
 0x5aa   :  { %v1967_v11 = vpop.eup %1966 }
 0x5ab   :  { %v1490_v41 = vmul.f32 %v1967_v11, %v1955_v56  ;;  %v1969_v55 = vpop.eup %1968 }
 0x5ac   :  { %v1484_v47 = vmul.f32 %v1969_v55, %v1947_v44 }
 0x5ad   :  { %v1971_v12 = vpop.eup %1970  ;;  %v1507_v18 = vcombine.low %v1486_v14, %v1490_v41 }
 0x5ae   :  { %v1973_v16 = vpop.eup %1972  ;;  %v1496_v17 = vmul.f32 %v1971_v12, %v1957_v62  ;;  %v1499_v59 = vcombine.low %v1484_v47, %v1488_v15 }
 0x5af   :  { %v1975_v19 = vpop.eup %1974  ;;  %v1492_v20 = vmul.f32 %v1973_v16, %v1953_v52  ;;  %v1514_v25 = vrot.slane %v1507_v18, %v2232_v13 }
 0x5b0   :  { %v1494_v34 = vmul.f32 %v1975_v19, %v1959_v63  ;;  %v1506_v27 = vrot.slane %v1499_v59, %v2232_v13 }
 0x5b1   :  { %v1515_v26 = vcombine.low %v1492_v20, %v1496_v17 }
 0x5b2   :  { %v1977_v23 = vpop.eup %1976  ;;  %v1532_v22 = vcombine.high %v1506_v27, %v1514_v25  ;;  %v1531_v31 = vcombine.low %v1506_v27, %v1514_v25 }
 0x5b3   :  { %v1498_v24 = vmul.f32 %v1977_v23, %v1961_v61  ;;  %v1522_v29 = vrot.slane %v1515_v26, %v2232_v13 }
 0x5b4   :  { %v1546_v33 = vrot.slane %v1532_v22, %v2235_v21  ;;  %v1539_v38 = vrot.slane %v1531_v31, %v2235_v21 }
 0x5b5   :  { %v1523_v28 = vcombine.low %v1494_v34, %v1498_v24 }
 0x5b7   :  { %v1530_v30 = vrot.slane %v1523_v28, %v2232_v13 }
 0x5b9   :  { %v1548_v32 = vcombine.high %v1522_v29, %v1530_v30  ;;  %v1547_v35 = vcombine.low %v1522_v29, %v1530_v30 }
 0x5bb   :  { %v1562_v37 = vrot.slane %v1548_v32, %v2235_v21  ;;  %v1555_v39 = vrot.slane %v1547_v35, %v2235_v21 }
 0x5bd   :  { %v1565_v40 = vcombine.low %v1546_v33, %v1562_v37  ;;  %v1564_v42 = vcombine.high %v1539_v38, %v1555_v39  ;;  %v1563_v43 = vcombine.low %v1539_v38, %v1555_v39  ;;  %v1566_v13 = vcombine.high %v1546_v33, %v1562_v37 }
 0x5bf   :  { %1572 = vrot.lane.b32.xlu0 %v1565_v40, %s2111_s20  ;;  %1568 = vrot.lane.b32.xlu1 %v1564_v42, %s2115_s30  ;;  %s2078_s20 = scalar_lea.vmem %s1593_s24, 128 }
 0x5c0   :  { %p2079_p11 = scmp.ne.s32.totalorder %s1593_s24, %s2078_s20  ;;  %p2084_p13 = scmp.lt.s32.totalorder %s2078_s20, %s2078_s20 }
 0x5c2   :  { %p2085_p0 = por %p2084_p13, %p2083_p12 }
 0x5c3   :  { %1576 = vrot.lane.b32.xlu1 %v1566_v13, %s2126_s8 }
 0x5c4   :  { %p2086_p1 = pnand %p2085_p0, %p2079_p11 }
 0x631   :  { %v1569_v0 = vpop.permute.xlu1 %1568  ;;  %v1573_v36 = vpop.permute.xlu0 %1572 }
 0x632   :  { %v1580_v44 = vsel %vm1579_vm3, %v1563_v43, %v1569_v0 }
 0x633   :  { %v1581_v21 = vsel %vm117_vm1, %v1580_v44, %v1573_v36 }
 0x635   :  { %v1577_v45 = vpop.permute.xlu1 %1576 }
 0x636   :  { %v1583_v48 = vsel %vm1582_vm4, %v1581_v21, %v1577_v45 }
 0x637   :  { %1585 = vst.msk [vmem:[#allocation11] sm:$0xff] %vm1584_vm5, %v1583_v48 }
 0x638   :  { %2089 = shalt.err (!%p2086_p1)
}
 0x639   :  { %1595 = dma.vmem_to_hbm [thread:$0]  %s1593_s24, 128, %s2333_s9, [#allocation4]  }
 0x63a   :  { %2104 = dma.done.wait [#allocation4], 128  }
 0x63b   :  { %2105 = vsyncadd [#allocation4], 4294967168 }
 0x63c   :  { %1599 = vsyncpa [#allocation3], 1 }
 0x63d   :  { %1600 = vsyncpa [#allocation6], 1 }
 0x63e   :  { %1601 = vsyncpa [#allocation9], 1 }
 0x63f   :  { %1602 = vsyncpa [#allocation4], 1 }

</bundles_post_ra>
